<compile_context>
chip_gen: v7x
topology: tpu7x:2x2x1
jax: 0.10.0
libtpu: 0.0.40
codegen_flags: <defaults>
</compile_context>

<pallas_src>
import functools
import math

import jax
import jax.numpy as jnp
from jax.experimental import pallas as pl
from jax.experimental.pallas import tpu as pltpu


# ----------------------------------------------------------------------------
# Fused kernel
# ----------------------------------------------------------------------------

def _time_embedding_kernel(t_ref, table_hbm, w2_ref, b2_ref, o_ref,
                           emb_vmem, copy_sem, *, batch):
    """Fused forward: HBM row-gather -> Mish -> fused (fc2 . 1x1 conv) matmul.

    t_ref     : SMEM int32 [B]                    diffusion-step indices
    table_hbm : HBM  f32   [n_diff, dim_latent]   pre-activation table (table@W1^T + b1)
    w2_ref    : VMEM bf16  [dim_latent, C*dim]    fc2 weight with 1x1 conv folded in
    b2_ref    : VMEM f32   [1, C*dim]             fused bias
    o_ref     : VMEM f32   [B, C*dim]             lane-dense output slab
    emb_vmem  : VMEM f32   [B, dim_latent]        gathered rows (scratch)
    copy_sem  : DMA sems   [B]
    """
    # 1) Gather: DMA only the B indexed rows HBM -> VMEM (table never resident
    #    in VMEM; per-call table traffic = B * dim_latent * 4 bytes).
    copies = []
    for b in range(batch):
        cp = pltpu.make_async_copy(
            table_hbm.at[pl.ds(t_ref[b], 1), :],
            emb_vmem.at[pl.ds(b, 1), :],
            copy_sem.at[b])
        cp.start()
        copies.append(cp)
    for cp in copies:
        cp.wait()

    # 2) Mish in f32: x * tanh(softplus(x)) via the stable exp(-|x|) form
    #    (one EUP exp + one approx reciprocal; VPU does the rest).
    h = emb_vmem[...]
    a = jnp.exp(-jnp.abs(h))
    a2 = a * a
    pos = h >= 0.0
    num = jnp.where(pos, 1.0 + 2.0 * a, a2 + 2.0 * a)
    den = jnp.where(pos, 1.0 + 2.0 * a + 2.0 * a2, a2 + 2.0 * a + 2.0)
    h = h * num * pl.reciprocal(den, approx=True)

    # 3) Fused fc2 + (optional) 1x1 conv: single lane-dense N = C*dim matmul,
    #    bf16 MXU operands, f32 accumulation, f32 bias add, full-width vst.
    o_ref[...] = jnp.dot(h.astype(jnp.bfloat16), w2_ref[...],
                         preferred_element_type=jnp.float32) + b2_ref[...]


# ----------------------------------------------------------------------------
# Wrapper
# ----------------------------------------------------------------------------

def time_embedding_forward(params, t):
    """t: int32 [B]  ->  [B, dim] if n_channels == 1 else [B, n_channels, dim]."""
    batch = t.shape[0]
    n_channels = params["n_channels"]
    dim = params["dim"]
    out_cols = n_channels * dim
    dim_latent = params["pre_table"].shape[-1]

    flops = 2 * batch * dim_latent * out_cols + 10 * batch * dim_latent
    transcendentals = 2 * batch * dim_latent
    bytes_accessed = (batch * dim_latent * 4                 # gathered rows only
                      + params["w2p"].size * 2 + out_cols * 4
                      + batch * 4 + batch * out_cols * 4)

    out = pl.pallas_call(
        functools.partial(_time_embedding_kernel, batch=batch),
        out_shape=jax.ShapeDtypeStruct((batch, out_cols), jnp.float32),
        in_specs=[
            pl.BlockSpec(memory_space=pltpu.MemorySpace.SMEM),   # t (scalar indices)
            pl.BlockSpec(memory_space=pl.ANY),                   # pre_table stays in HBM
            pl.BlockSpec(memory_space=pltpu.MemorySpace.VMEM),   # fused W2' (bf16)
            pl.BlockSpec(memory_space=pltpu.MemorySpace.VMEM),   # fused b2' (f32)
        ],
        out_specs=pl.BlockSpec(memory_space=pltpu.MemorySpace.VMEM),
        scratch_shapes=[pltpu.VMEM((batch, dim_latent), jnp.float32),
                        pltpu.SemaphoreType.DMA((batch,))],
        cost_estimate=pl.CostEstimate(flops=int(flops),
                                      transcendentals=int(transcendentals),
                                      bytes_accessed=int(bytes_accessed)),
    )(t.astype(jnp.int32), params["pre_table"], params["w2p"], params["b2p"])

    if n_channels > 1:
        return out.reshape(batch, n_channels, dim)
    return out


# ----------------------------------------------------------------------------
# Parameter construction (mirrors the PyTorch __init__ shapes & default init)
# ----------------------------------------------------------------------------

def init_time_embedding(key, dim, number_of_diffusions, n_channels=1,
                        dim_embed=64, dim_latent=128):
    k1, k2, k3, k4, k5, k6 = jax.random.split(key, 6)

    def uniform(k, shape, fan_in):
        bound = 1.0 / math.sqrt(fan_in)
        return jax.random.uniform(k, shape, jnp.float32, -bound, bound)

    # f32 master copies (PyTorch layouts)
    fc1_w = uniform(k1, (dim_latent, dim_embed), dim_embed)
    fc1_b = uniform(k2, (dim_latent,), dim_embed)
    fc2_w = uniform(k3, (dim, dim_latent), dim_latent)
    fc2_b = uniform(k4, (dim,), dim_latent)
    if n_channels > 1:
        conv_w = uniform(k5, (n_channels, 1, 1), 1)
        conv_b = uniform(k6, (n_channels,), 1)
    else:                       # identity (module has no out_conv in this case)
        conv_w = jnp.ones((1, 1, 1), jnp.float32)
        conv_b = jnp.zeros((1,), jnp.float32)

    # sinusoidal embedding table (matches embed_table())
    steps = jnp.arange(number_of_diffusions, dtype=jnp.float32) + 1.0
    half = dim_embed // 2
    denom = max(half - 1, 1)                                 # guard dim_embed == 2
    freqs = jnp.exp(jnp.arange(half, dtype=jnp.float32) * -(10.0 / denom))
    emb = steps[:, None] * freqs[None, :]
    table = jnp.concatenate([jnp.sin(emb), jnp.cos(emb)], axis=-1)   # [n_diff, dim_embed]

    # Fold the (frozen) table through fc1 offline in f32 (gather and fc1 are both
    # linear, so they commute).  Forward-only simplification; keeps full f32 accuracy
    # for the fc1 stage and removes one matmul + two operands from every call.
    pre_table = table @ fc1_w.T + fc1_b                      # [n_diff, dim_latent] f32

    # Fold the optional Conv1d(1, C, 1) into fc2: column block c = W2^T * conv_w[c],
    # bias block c = b2 * conv_w[c] + conv_b[c]  -> one lane-dense N = C*dim matmul.
    cw = conv_w.reshape(n_channels)                          # [C]
    w2p = (fc2_w.T[:, None, :] * cw[None, :, None]).reshape(dim_latent, n_channels * dim)
    b2p = (fc2_b[None, :] * cw[:, None] + conv_b[:, None]).reshape(1, n_channels * dim)

    return {
        "dim": dim,
        "n_channels": n_channels,
        "pre_table": pre_table.astype(jnp.float32),          # stays in HBM, row-gathered
        "w2p": w2p.astype(jnp.bfloat16),                     # [dim_latent, C*dim]
        "b2p": b2p.astype(jnp.float32),                      # [1, C*dim]
        # f32 reference copies for correctness checking
        "ref": {"table": table, "fc1_w": fc1_w, "fc1_b": fc1_b,
                "fc2_w": fc2_w, "fc2_b": fc2_b,
                "conv_w": conv_w, "conv_b": conv_b},
    }


def time_embedding_reference(params, t):
    """Pure-JAX f32 reference matching the PyTorch forward exactly."""
    r = params["ref"]
    emb = r["table"][t]
    out = emb @ r["fc1_w"].T + r["fc1_b"]
    out = out * jnp.tanh(jax.nn.softplus(out))
    out = out @ r["fc2_w"].T + r["fc2_b"]
    if params["n_channels"] > 1:
        out = out[:, None, :]
        out = r["conv_w"].reshape(1, params["n_channels"], 1) * out \
              + r["conv_b"].reshape(1, params["n_channels"], 1)
    return out


# ----------------------------------------------------------------------------
# Main
# ----------------------------------------------------------------------------

if __name__ == "__main__":
    DIM = 64
    N_DIFFUSIONS = 10
    DIM_EMBED = 64
    DIM_LATENT = 128
    BATCH = 2

    key = jax.random.PRNGKey(0)
    k_multi, k_single = jax.random.split(key)
    t = jnp.array([3, 7], dtype=jnp.int32)

    # n_channels > 1 path (exercises the fused 1x1 out_conv)
    params_c = init_time_embedding(k_multi, DIM, N_DIFFUSIONS, n_channels=4,
                                   dim_embed=DIM_EMBED, dim_latent=DIM_LATENT)
    fwd_c = jax.jit(functools.partial(time_embedding_forward, params_c))
    out_c = jax.block_until_ready(fwd_c(t))
    assert out_c.shape == (BATCH, 4, DIM), out_c.shape
    assert bool(jnp.all(jnp.isfinite(out_c)))
    ref_c = time_embedding_reference(params_c, t)
    err_c = float(jnp.max(jnp.abs(out_c - ref_c)))
    assert err_c < 3e-2, err_c   # bf16 MXU operands + approx reciprocal, f32 accumulate

    # n_channels == 1 path (plain fc1 -> Mish -> fc2)
    params_s = init_time_embedding(k_single, DIM, N_DIFFUSIONS, n_channels=1,
                                   dim_embed=DIM_EMBED, dim_latent=DIM_LATENT)
    fwd_s = jax.jit(functools.partial(time_embedding_forward, params_s))
    out_s = jax.block_until_ready(fwd_s(t))
    assert out_s.shape == (BATCH, DIM), out_s.shape
    assert bool(jnp.all(jnp.isfinite(out_s)))
    ref_s = time_embedding_reference(params_s, t)
    err_s = float(jnp.max(jnp.abs(out_s - ref_s)))
    assert err_s < 3e-2, err_s

    print("KERNEL_OK")
</pallas_src>

<mosaic_0001>
module attributes {stable_mosaic.version = 11 : i64} {
  func.func @_time_embedding_kernel(%arg0: memref<2xi32, #tpu.memory_space<smem>>, %arg1: memref<10x128xf32, #tpu.memory_space<any>>, %arg2: memref<128x256xbf16, #tpu.memory_space<vmem>>, %arg3: memref<1x256xf32, #tpu.memory_space<vmem>>, %arg4: memref<2x256xf32, #tpu.memory_space<vmem>>, %arg5: memref<2x128xf32, #tpu.memory_space<vmem>>, %arg6: memref<2x!tpu.dma_semaphore, #tpu.memory_space<semaphore_mem>>) attributes {dimension_semantics = [], scalar_prefetch = 0 : i64, scratch_operands = 2 : i64, tpu.core_type = #tpu.core_type<tc>} {
    %c0 = arith.constant 0 : index
    %0 = memref.load %arg0[%c0] : memref<2xi32, #tpu.memory_space<smem>>
    %c0_i32 = arith.constant 0 : i32
    %c0_i32_0 = arith.constant 0 : i32
    %1 = tpu.memref_slice %arg1[%0, %c0_i32_0] : memref<10x128xf32, #tpu.memory_space<any>> -> memref<1x128xf32, #tpu.memory_space<any>>
    %c0_i32_1 = arith.constant 0 : i32
    %c0_i32_2 = arith.constant 0 : i32
    %2 = tpu.memref_slice %arg5[%c0_i32_1, %c0_i32_2] : memref<2x128xf32, #tpu.memory_space<vmem>> -> memref<1x128xf32, #tpu.memory_space<vmem>>
    %3 = tpu.memref_slice %arg6[%c0_i32] : memref<2x!tpu.dma_semaphore, #tpu.memory_space<semaphore_mem>> -> memref<1x!tpu.dma_semaphore, #tpu.memory_space<semaphore_mem>>
    %4 = tpu.memref_squeeze %3 : memref<1x!tpu.dma_semaphore, #tpu.memory_space<semaphore_mem>> -> memref<!tpu.dma_semaphore, #tpu.memory_space<semaphore_mem>>
    tpu.enqueue_dma source(%1 : memref<1x128xf32, #tpu.memory_space<any>>) target(%2 : memref<1x128xf32, #tpu.memory_space<vmem>>) target_semaphore(%4 : memref<!tpu.dma_semaphore, #tpu.memory_space<semaphore_mem>>)
    %c1 = arith.constant 1 : index
    %5 = memref.load %arg0[%c1] : memref<2xi32, #tpu.memory_space<smem>>
    %c1_i32 = arith.constant 1 : i32
    %c0_i32_3 = arith.constant 0 : i32
    %6 = tpu.memref_slice %arg1[%5, %c0_i32_3] : memref<10x128xf32, #tpu.memory_space<any>> -> memref<1x128xf32, #tpu.memory_space<any>>
    %c1_i32_4 = arith.constant 1 : i32
    %c0_i32_5 = arith.constant 0 : i32
    %7 = tpu.memref_slice %arg5[%c1_i32_4, %c0_i32_5] : memref<2x128xf32, #tpu.memory_space<vmem>> -> memref<1x128xf32, #tpu.memory_space<vmem>>
    %8 = tpu.memref_slice %arg6[%c1_i32] : memref<2x!tpu.dma_semaphore, #tpu.memory_space<semaphore_mem>> -> memref<1x!tpu.dma_semaphore, #tpu.memory_space<semaphore_mem>>
    %9 = tpu.memref_squeeze %8 : memref<1x!tpu.dma_semaphore, #tpu.memory_space<semaphore_mem>> -> memref<!tpu.dma_semaphore, #tpu.memory_space<semaphore_mem>>
    tpu.enqueue_dma source(%6 : memref<1x128xf32, #tpu.memory_space<any>>) target(%7 : memref<1x128xf32, #tpu.memory_space<vmem>>) target_semaphore(%9 : memref<!tpu.dma_semaphore, #tpu.memory_space<semaphore_mem>>)
    %c0_i32_6 = arith.constant 0 : i32
    %c0_i32_7 = arith.constant 0 : i32
    %10 = tpu.memref_slice %arg1[%0, %c0_i32_7] : memref<10x128xf32, #tpu.memory_space<any>> -> memref<1x128xf32, #tpu.memory_space<any>>
    %c0_i32_8 = arith.constant 0 : i32
    %c0_i32_9 = arith.constant 0 : i32
    %11 = tpu.memref_slice %arg5[%c0_i32_8, %c0_i32_9] : memref<2x128xf32, #tpu.memory_space<vmem>> -> memref<1x128xf32, #tpu.memory_space<vmem>>
    %12 = tpu.memref_slice %arg6[%c0_i32_6] : memref<2x!tpu.dma_semaphore, #tpu.memory_space<semaphore_mem>> -> memref<1x!tpu.dma_semaphore, #tpu.memory_space<semaphore_mem>>
    %13 = tpu.memref_squeeze %12 : memref<1x!tpu.dma_semaphore, #tpu.memory_space<semaphore_mem>> -> memref<!tpu.dma_semaphore, #tpu.memory_space<semaphore_mem>>
    tpu.wait_dma2 semaphore(%13 : memref<!tpu.dma_semaphore, #tpu.memory_space<semaphore_mem>>) src(%10 : memref<1x128xf32, #tpu.memory_space<any>>) dst(%11 : memref<1x128xf32, #tpu.memory_space<vmem>>)
    %c1_i32_10 = arith.constant 1 : i32
    %c0_i32_11 = arith.constant 0 : i32
    %14 = tpu.memref_slice %arg1[%5, %c0_i32_11] : memref<10x128xf32, #tpu.memory_space<any>> -> memref<1x128xf32, #tpu.memory_space<any>>
    %c1_i32_12 = arith.constant 1 : i32
    %c0_i32_13 = arith.constant 0 : i32
    %15 = tpu.memref_slice %arg5[%c1_i32_12, %c0_i32_13] : memref<2x128xf32, #tpu.memory_space<vmem>> -> memref<1x128xf32, #tpu.memory_space<vmem>>
    %16 = tpu.memref_slice %arg6[%c1_i32_10] : memref<2x!tpu.dma_semaphore, #tpu.memory_space<semaphore_mem>> -> memref<1x!tpu.dma_semaphore, #tpu.memory_space<semaphore_mem>>
    %17 = tpu.memref_squeeze %16 : memref<1x!tpu.dma_semaphore, #tpu.memory_space<semaphore_mem>> -> memref<!tpu.dma_semaphore, #tpu.memory_space<semaphore_mem>>
    tpu.wait_dma2 semaphore(%17 : memref<!tpu.dma_semaphore, #tpu.memory_space<semaphore_mem>>) src(%14 : memref<1x128xf32, #tpu.memory_space<any>>) dst(%15 : memref<1x128xf32, #tpu.memory_space<vmem>>)
    %c0_14 = arith.constant 0 : index
    %c0_15 = arith.constant 0 : index
    %18 = vector.load %arg5[%c0_14, %c0_15] : memref<2x128xf32, #tpu.memory_space<vmem>>, vector<2x128xf32>
    %19 = math.absf %18 : vector<2x128xf32>
    %cst = arith.constant 0.000000e+00 : f32
    %20 = vector.broadcast %cst : f32 to vector<2x128xf32>
    %21 = arith.subf %20, %19 : vector<2x128xf32>
    %22 = math.exp %21 : vector<2x128xf32>
    %23 = arith.mulf %22, %22 : vector<2x128xf32>
    %cst_16 = arith.constant 0.000000e+00 : f32
    %24 = vector.broadcast %cst_16 : f32 to vector<2x128xf32>
    %25 = arith.cmpf oge, %18, %24 : vector<2x128xf32>
    %cst_17 = arith.constant 2.000000e+00 : f32
    %26 = vector.broadcast %cst_17 : f32 to vector<2x128xf32>
    %27 = arith.mulf %26, %22 : vector<2x128xf32>
    %cst_18 = arith.constant 1.000000e+00 : f32
    %28 = vector.broadcast %cst_18 : f32 to vector<2x128xf32>
    %29 = arith.addf %28, %27 : vector<2x128xf32>
    %cst_19 = arith.constant 2.000000e+00 : f32
    %30 = vector.broadcast %cst_19 : f32 to vector<2x128xf32>
    %31 = arith.mulf %30, %22 : vector<2x128xf32>
    %32 = arith.addf %23, %31 : vector<2x128xf32>
    %33 = arith.select %25, %29, %32 : vector<2x128xi1>, vector<2x128xf32>
    %cst_20 = arith.constant 2.000000e+00 : f32
    %34 = vector.broadcast %cst_20 : f32 to vector<2x128xf32>
    %35 = arith.mulf %34, %22 : vector<2x128xf32>
    %cst_21 = arith.constant 1.000000e+00 : f32
    %36 = vector.broadcast %cst_21 : f32 to vector<2x128xf32>
    %37 = arith.addf %36, %35 : vector<2x128xf32>
    %cst_22 = arith.constant 2.000000e+00 : f32
    %38 = vector.broadcast %cst_22 : f32 to vector<2x128xf32>
    %39 = arith.mulf %38, %23 : vector<2x128xf32>
    %40 = arith.addf %37, %39 : vector<2x128xf32>
    %cst_23 = arith.constant 2.000000e+00 : f32
    %41 = vector.broadcast %cst_23 : f32 to vector<2x128xf32>
    %42 = arith.mulf %41, %22 : vector<2x128xf32>
    %43 = arith.addf %23, %42 : vector<2x128xf32>
    %cst_24 = arith.constant 2.000000e+00 : f32
    %44 = vector.broadcast %cst_24 : f32 to vector<2x128xf32>
    %45 = arith.addf %43, %44 : vector<2x128xf32>
    %46 = arith.select %25, %40, %45 : vector<2x128xi1>, vector<2x128xf32>
    %47 = arith.mulf %18, %33 : vector<2x128xf32>
    %48 = tpu.reciprocal %46 {approx = true} : vector<2x128xf32> -> vector<2x128xf32>
    %49 = arith.mulf %47, %48 : vector<2x128xf32>
    %50 = arith.truncf %49 : vector<2x128xf32> to vector<2x128xbf16>
    %c0_25 = arith.constant 0 : index
    %c0_26 = arith.constant 0 : index
    %51 = vector.load %arg2[%c0_25, %c0_26] : memref<128x256xbf16, #tpu.memory_space<vmem>>, vector<128x256xbf16>
    %cst_27 = arith.constant dense<0.000000e+00> : vector<2x256xf32>
    %52 = tpu.matmul %50, %51, %cst_27 {dimension_numbers = #tpu.dot_dimension_numbers<[1], [0], [0], [1], [0, 0, 1, 1], [], []>} : vector<2x128xbf16>, vector<128x256xbf16>, vector<2x256xf32> -> vector<2x256xf32>
    %c0_28 = arith.constant 0 : index
    %c0_29 = arith.constant 0 : index
    %53 = vector.load %arg3[%c0_28, %c0_29] : memref<1x256xf32, #tpu.memory_space<vmem>>, vector<1x256xf32>
    %54 = vector.broadcast %53 : vector<1x256xf32> to vector<2x256xf32>
    %55 = arith.addf %52, %54 : vector<2x256xf32>
    %c0_30 = arith.constant 0 : index
    %c0_31 = arith.constant 0 : index
    %56 = vector.load %arg4[%c0_30, %c0_31] : memref<2x256xf32, #tpu.memory_space<vmem>>, vector<2x256xf32>
    tpu.vector_store %arg4[%c0_30, %c0_31], %55 {strides = array<i32>} : memref<2x256xf32, #tpu.memory_space<vmem>>, vector<2x256xf32>,
    return
  }
}

</mosaic_0001>

<bundles_post_ra>
// kernel: time_embedding_forward.1
= control target key start
LH: loop header
LB: loop body
LE: loop exit
PB: predicated region body
PF: predicated region fallthrough
CT: control target
= control target key end

     0   :  { %9 = vsyncpa [#allocation5], 0  ;;  %s507_s0 = inlined_call_operand.vmem [shape: s32[2], index: 0, kind: input, shape index: {}]   ;;  %s508_s1 = inlined_call_operand.vmem [shape: f32[10,128], index: 1, kind: input, shape index: {}]   ;;  %s509_s2 = inlined_call_operand.vmem [shape: bf16[128,256], index: 2, kind: input, shape index: {}]   ;;  %s510_s3 = inlined_call_operand.vmem [shape: f32[1,256], index: 3, kind: input, shape index: {}]   ;;  %s511_s4 = inlined_call_operand.vmem [shape: f32[2,256], index: 4, kind: output, shape index: {}]  }
   0x1   :  { %s16_s17 = sshll.u32 %s507_s0, 4  ;;  %s17_s17 = int_to_ptr.vmem [resolvable:$true] %s16_s17 }
   0x2   :  { %s399_s18 = scalar_lea.vmem %s17_s17, 16  ;;  %p404_p1 = scmp.lt.s32.totalorder %s17_s17, %s17_s17 }
   0x3   :  { %p400_p0 = scmp.ne.s32.totalorder %s17_s17, %s399_s18  ;;  %p405_p2 = scmp.lt.s32.totalorder %s399_s18, %s399_s18 }
   0x5   :  { %p406_p3 = por %p405_p2, %p404_p1 }
   0x7   :  { %p407_p4 = pnand %p406_p3, %p400_p0 }
   0x9   :  { %410 = shalt.err (!%p407_p4)
}
   0xa   :  { %s417_s19 = smov [#allocation4]  }
   0xb   :  { %19 = dma.vmem_to_smem %s17_s17, 16, %s417_s19, [#allocation5]  }
   0xc   :  { %411 = dma.done.wait [#allocation5], 16  }
   0xd   :  { %412 = vsyncadd [#allocation5], 4294967280 }
   0xe   :  { %27 = sfence }
   0xf   :  { %s29_s20 = sld [smem:[#allocation4]] }
  0x15   :  { %s30_s23 = scalar_lea.vmem %s508_s1, %s29_s20 }
  0x16   :  { %v48_v0 = vld [vmem:[%s30_s23] sm:$0x1] }
  0x17   :  { %49 = vst [vmem:[#allocation2] sm:$0x1] %v48_v0 }
  0x18   :  { %74 = vsyncadd [#allocation3], 16  ;;  %s349_s0 = sld [smem:[#allocation4 + $0x1]] }
  0x1e   :  { %s76_s26 = scalar_lea.vmem %s508_s1, %s349_s0 }
  0x1f   :  { %v96_v1 = vld [vmem:[%s76_s26] sm:$0x1] }
  0x20   :  { %97 = vst [vmem:[#allocation2 + $0x1] sm:$0x1] %v96_v1 }
  0x21   :  { %122 = vsyncadd [#allocation3 + $0x1], 16 }
  0x22   :  { %413 = dma.done.wait [#allocation3], 16 }
  0x23   :  { %414 = vsyncadd [#allocation3], 4294967280 }
  0x24   :  { %415 = dma.done.wait [#allocation3 + $0x1], 16 }
  0x25   :  { %416 = vsyncadd [#allocation3 + $0x1], 4294967280  ;;  %v418_v2 = vmov 0   ;;  %v371_v3 = vld [vmem:[%s509_s2 + $0x4] ss:$8 sps:$4 sm:$0xff]   ;;  %v165_v37 = vlaneseq }
  0x26   :  { %287 = vmatprep.mubr.bf16.mxu0 %v418_v2  ;;  %v373_v4 = vld [vmem:[%s509_s2] ss:$8 sps:$4 sm:$0xff]   ;;  %255 = vmatprep.subr.bf16.mxu0 %v371_v3  ;;  %v374_v5 = vld [vmem:[%s509_s2 + $0x14] ss:$8 sps:$4 sm:$0xff]   ;;  %v376_v6 = vld [vmem:[%s509_s2 + $0x10] ss:$8 sps:$4 sm:$0xff]  }
  0x27   :  { %256 = vmatpush1.bf16.msra.mxu0 %v373_v4  ;;  %v377_v7 = vld [vmem:[%s509_s2 + $0x24] ss:$8 sps:$4 sm:$0xff]   ;;  %v379_v8 = vld [vmem:[%s509_s2 + $0x20] ss:$8 sps:$4 sm:$0xff]   ;;  %v380_v9 = vld [vmem:[%s509_s2 + $0x34] ss:$8 sps:$4 sm:$0xff]  }
  0x28   :  { %257 = vmatprep.subr.bf16.mxu0 %v374_v5  ;;  %v128_v10 = vld [vmem:[#allocation2] sm:$0x3]  ;;  %v382_v11 = vld [vmem:[%s509_s2 + $0x30] ss:$8 sps:$4 sm:$0xff]   ;;  %v383_v13 = vld [vmem:[%s509_s2 + $0x44] ss:$8 sps:$4 sm:$0xff]  }
  0x29   :  { %v129_v12 = vand.u32 2147483647, %v128_v10  ;;  %v385_v15 = vld [vmem:[%s509_s2 + $0x40] ss:$8 sps:$4 sm:$0xff]   ;;  %v386_v17 = vld [vmem:[%s509_s2 + $0x54] ss:$8 sps:$4 sm:$0xff]  }
  0x2a   :  { %v388_v18 = vld [vmem:[%s509_s2 + $0x50] ss:$8 sps:$4 sm:$0xff]   ;;  %v389_v19 = vld [vmem:[%s509_s2 + $0x64] ss:$8 sps:$4 sm:$0xff]   ;;  %v391_v20 = vld [vmem:[%s509_s2 + $0x60] ss:$8 sps:$4 sm:$0xff]  }
  0x2b   :  { %258 = vmatpush1.bf16.msra.mxu0 %v376_v6  ;;  %v130_v14 = vsub.f32 0.0, %v129_v12  ;;  %v392_v21 = vld [vmem:[%s509_s2 + $0x74] ss:$8 sps:$4 sm:$0xff]   ;;  %v394_v23 = vld [vmem:[%s509_s2 + $0x70] ss:$8 sps:$4 sm:$0xff]   ;;  %vm134_vm0 = vcmp.ge.f32.partialorder %v128_v10, 0.0 }
  0x2c   :  { %259 = vmatprep.subr.bf16.mxu0 %v377_v7  ;;  %v166_v38 = vshrl.u32 %v165_v37, 7  ;;  %v163_v40 = vld [vmem:[%s510_s3] sm:$0x3] }
  0x2d   :  { %v131_v16 = vmul.f32 1.442695, %v130_v14 }
  0x2e   :  { %v167_v39 = vsub.s32 0, %v166_v38  ;;  %v171_v41 = vsub.s32 1, %v166_v38 }
  0x2f   :  { %260 = vmatpush1.bf16.msra.mxu0 %v379_v8  ;;  %395 = vpow2.f32 %v131_v16 }
  0x30   :  { %261 = vmatprep.subr.bf16.mxu0 %v380_v9  ;;  %v168_v42 = vrot.slane %v163_v40, %v167_v39  ;;  %v172_v43 = vrot.slane %v163_v40, %v171_v41 }
  0x33   :  { %262 = vmatpush1.bf16.msra.mxu0 %v382_v11 }
  0x34   :  { %263 = vmatprep.subr.bf16.mxu0 %v383_v13 }
  0x37   :  { %264 = vmatpush1.bf16.msra.mxu0 %v385_v15 }
  0x38   :  { %265 = vmatprep.subr.bf16.mxu0 %v386_v17 }
  0x39   :  { %v396_v22 = vpop.eup %395 }
  0x3a   :  { %v133_v24 = vmul.f32 %v396_v22, %v396_v22  ;;  %v135_v25 = vmul.f32 2.0, %v396_v22 }
  0x3b   :  { %266 = vmatpush1.bf16.msra.mxu0 %v388_v18 }
  0x3c   :  { %267 = vmatprep.subr.bf16.mxu0 %v389_v19  ;;  %v136_v26 = vadd.f32 1.0, %v135_v25  ;;  %v137_v27 = vadd.f32 %v135_v25, %v133_v24  ;;  %v139_v28 = vmul.f32 2.0, %v133_v24 }
  0x3e   :  { %v140_v29 = vadd.f32 %v139_v28, %v136_v26  ;;  %v141_v30 = vadd.f32 2.0, %v137_v27  ;;  %v138_v32 = vsel %vm134_vm0, %v136_v26, %v137_v27 }
  0x3f   :  { %268 = vmatpush1.bf16.msra.mxu0 %v391_v20  ;;  %v143_v33 = vmul.f32 %v138_v32, %v128_v10 }
  0x40   :  { %269 = vmatprep.subr.bf16.mxu0 %v392_v21  ;;  %v142_v31 = vsel %vm134_vm0, %v140_v29, %v141_v30 }
  0x41   :  { %397 = vrcp.f32 %v142_v31 }
  0x43   :  { %270 = vmatpush1.bf16.msra.mxu0 %v394_v23 }
  0x4b   :  { %v398_v34 = vpop.eup %397 }
  0x4c   :  { %v145_v35 = vmul.f32 %v398_v34, %v143_v33 }
  0x4e   :  { %v146_v36 = vpack.c.bf16 %v145_v35, %v145_v35 }
  0x50   :  { %288 = vmatmul.mubr.bf16.vlgmr.msra.gmra.mrb[0].mxu0 %v146_v36 }
 0x123   :  { %v289_v44 = vpop.f32.mrb[0].mxu0 }
 0x124   :  { %v290_v45 = vadd.f32 %v289_v44, %v168_v42  ;;  %v291_v46 = vpop.f32.mrb[1].mxu0 }
 0x125   :  { %v292_v47 = vadd.f32 %v291_v46, %v172_v43  ;;  %v293_v48 = vpop.f32.mrb[2].mxu0 }
 0x126   :  { %v294_v49 = vpop.f32.mrb[3].mxu0 }
 0x127   :  { %v298_v50 = vcombine.low %v290_v45, %v292_v47 }
 0x129   :  { %366 = vst.sshfl [vmem:[%s511_s4] sm:$0x33 pattern:$0x76325410] %v298_v50 }
 0x12a   :  { %312 = vsyncpa [#allocation5], 1 }
 0x12b   :  { %313 = vsyncmov [#allocation3] }
 0x12e   :  { %s314_s7 = vpop.sfrf %313 }
 0x12f   :  { %p367_p5 = scmp.ne.s32.totalorder %s314_s7, 0 }
 0x131   :  { %318 = shalt.err (%p367_p5)  }
 0x132   :  { %320 = vsyncmov [#allocation3 + $0x1] }
 0x135   :  { %s321_s3 = vpop.sfrf %320 }
 0x136   :  { %p368_p6 = scmp.ne.s32.totalorder %s321_s3, 0 }
 0x138   :  { %325 = shalt.err (%p368_p6)  }

</bundles_post_ra>
